<compile_context>
chip_gen: v7x
topology: tpu7x:2x2x1
jax: 0.10.0
libtpu: 0.0.40
codegen_flags: <defaults>
</compile_context>

<pallas_src>
import functools
import numpy as np

import jax
import jax.numpy as jnp
from jax.experimental import pallas as pl
from jax.experimental.pallas import tpu as pltpu


# ------------------------- hardware-aware tile config -------------------------

try:
    _VMEM_BYTES = int(pltpu.get_tpu_info().vmem_capacity_bytes)
except Exception:                      # unknown chip / emulator: assume v7x-like 64 MiB
    _VMEM_BYTES = 64 * 1024 * 1024

_BIG_VMEM = _VMEM_BYTES >= 100 * 1024 * 1024          # v5e / v6e (128 MiB VMEM)
_VMEM_LIMIT = (96 if _BIG_VMEM else 48) * 1024 * 1024  # leave headroom on v7x's 64 MiB
_ROW_CAP = 512 if _BIG_VMEM else 256                    # multiples of 8/16
_COL_CAP = 1024 if _BIG_VMEM else 512                   # multiples of 128

_ACT_DTYPE = jnp.bfloat16   # inter-kernel activations
_W_DTYPE = jnp.bfloat16     # MXU weight storage (depthwise / tiny pw weights stay f32)


def _cparams(*sem):
    return pltpu.CompilerParams(dimension_semantics=tuple(sem),
                                vmem_limit_bytes=_VMEM_LIMIT)


def _row_tile(m):
    return m if m <= _ROW_CAP else _ROW_CAP


def _col_tile(n):
    return n if n <= _COL_CAP else _COL_CAP


def _strip_rows(h, cap=8):
    # largest divisor of h that is <= cap (strip height for the gnconv kernel)
    if h <= cap:
        return h
    for s in range(cap, 0, -1):
        if h % s == 0:
            return s
    return h


# ----------------------------- Pallas kernels ------------------------------

def _gelu(x):
    # Exact-erf GELU via Abramowitz & Stegun 7.1.26 (|erf err| <= 1.5e-7, exact
    # division); well below the bf16 activation precision used between kernels.
    p = 0.3275911
    a1, a2, a3, a4, a5 = 0.254829592, -0.284496736, 1.421413741, -1.453152027, 1.061405429
    z = x * np.float32(1.0 / np.sqrt(2.0))
    s = jnp.sign(z)
    az = jnp.abs(z)
    t = 1.0 / (1.0 + p * az)
    poly = ((((a5 * t + a4) * t + a3) * t + a2) * t + a1) * t
    erf = s * (1.0 - poly * jnp.exp(-az * az))
    return 0.5 * x * (1.0 + erf)


def _ln_rows(x, w, b, eps):
    # per-row LayerNorm in f32
    u = jnp.mean(x, axis=-1, keepdims=True)
    xc = x - u
    var = jnp.mean(xc * xc, axis=-1, keepdims=True)
    return xc * jax.lax.rsqrt(var + eps) * w + b


def _ln_matmul_kernel(x_ref, lnw_ref, lnb_ref, w_ref, b_ref, o_ref, xn_ref,
                      *, eps, activation):
    # Row LayerNorm fused into the matmul prologue; the normalized tile is cached
    # in a VMEM scratch at j==0 and reused for every N tile (feedback item).
    @pl.when(pl.program_id(1) == 0)
    def _():
        xn = _ln_rows(x_ref[...].astype(jnp.float32), lnw_ref[...], lnb_ref[...], eps)
        xn_ref[...] = xn.astype(xn_ref.dtype)

    y = jnp.dot(xn_ref[...], w_ref[...].astype(jnp.bfloat16),
                preferred_element_type=jnp.float32) + b_ref[...]
    if activation == "gelu":
        y = _gelu(y)
    o_ref[...] = y.astype(o_ref.dtype)


def _matmul_res_kernel(x_ref, w_ref, b_ref, r_ref, g_ref, o_ref):
    # out = residual + gamma * (x @ w + b)   (bf16 operands, f32 accumulate)
    y = jnp.dot(x_ref[...], w_ref[...].astype(jnp.bfloat16),
                preferred_element_type=jnp.float32) + b_ref[...]
    o_ref[...] = (r_ref[...].astype(jnp.float32) + g_ref[...] * y).astype(o_ref.dtype)


def _patchify_kernel(x_ref, *refs, taps, c_in, eps, pre_ln, post_ln):
    # Non-overlapping kxk stride-k conv as a matmul over space-to-depth rows.
    #  pre_ln : the preceding channels_first LayerNorm applied per original pixel
    #           (per c_in-wide segment of the K axis) before each tap's dot.
    #  post_ln: the stem's post-conv LayerNorm applied as an epilogue (tn == N).
    idx = 0
    if pre_ln:
        plnw_ref, plnb_ref = refs[0], refs[1]
        idx = 2
    w_ref, b_ref = refs[idx], refs[idx + 1]
    idx += 2
    if post_ln:
        olnw_ref, olnb_ref = refs[idx], refs[idx + 1]
        idx += 2
    o_ref = refs[idx]

    if pre_ln:
        acc_ref = refs[idx + 1]
        acc_ref[...] = jnp.zeros_like(acc_ref)
        for t in range(taps):
            xt = x_ref[:, t * c_in:(t + 1) * c_in].astype(jnp.float32)
            xn = _ln_rows(xt, plnw_ref[...], plnb_ref[...], eps)
            acc_ref[...] += jnp.dot(xn.astype(jnp.bfloat16),
                                    w_ref[t * c_in:(t + 1) * c_in, :].astype(jnp.bfloat16),
                                    preferred_element_type=jnp.float32)
        y = acc_ref[...] + b_ref[...]
    else:
        y = jnp.dot(x_ref[...].astype(jnp.bfloat16), w_ref[...].astype(jnp.bfloat16),
                    preferred_element_type=jnp.float32) + b_ref[...]

    if post_ln:
        y = _ln_rows(y, olnw_ref[...], olnb_ref[...], eps)
    o_ref[...] = y.astype(o_ref.dtype)


def _gnconv_kernel(*refs, dims_g, H, SH):
    # One (batch, H-strip) tile of the gnconv tail:
    #   7x7 depthwise conv (scale pre-folded) + recursive gated pointwise chain
    #   + proj_out + gamma1 residual.  All intermediates stay on-chip; the padded
    #   halo window and the depthwise accumulator live in VMEM scratch.
    order = len(dims_g)
    n_pw = order - 1
    fused_ref, x_ref, dww_ref, dwb_ref = refs[:4]
    pw_w = refs[4:4 + n_pw]
    pw_b = refs[4 + n_pw:4 + 2 * n_pw]
    pow_ref = refs[4 + 2 * n_pw]
    pob_ref = refs[5 + 2 * n_pw]
    g_ref = refs[6 + 2 * n_pw]
    o_ref = refs[7 + 2 * n_pw]
    pad_ref = refs[8 + 2 * n_pw]
    acc_ref = refs[9 + 2 * n_pw]

    _, _, W, dim = o_ref.shape
    sumd = sum(dims_g)
    d0 = dims_g[0]
    Ms = SH * W
    r0 = pl.multiple_of(pl.program_id(1) * SH, SH)       # strip start row

    # ---- zero-padded strip window (only the 3-wide halo columns get zero-filled;
    #      interior rows are copied from the resident whole-image `abc` slice of
    #      `fused`, with out-of-image halo rows masked to zero) ----
    pad_ref[:, 0:3, :] = jnp.zeros((SH + 6, 3, sumd), jnp.float32)
    pad_ref[:, W + 3:W + 6, :] = jnp.zeros((SH + 6, 3, sumd), jnp.float32)
    for i in range(SH + 6):
        src = r0 + (i - 3)
        keep = jnp.logical_and(src >= 0, src < H).astype(jnp.float32)
        src_c = jnp.clip(src, 0, H - 1)
        row = fused_ref[0, pl.ds(src_c, 1), :, 0:sumd]            # (1, W, sumd) bf16
        pad_ref[i, 3:3 + W, :] = row[0].astype(jnp.float32) * keep

    # ---- 7x7 depthwise conv, stride 1, "same" padding (gnconv scale folded in);
    #      accumulate per output-row-of-taps into the VMEM scratch ----
    acc_ref[...] = jnp.zeros((SH, W, sumd), jnp.float32) + dwb_ref[...]
    for kh in range(7):
        part = pad_ref[kh:kh + SH, 0:W, :] * dww_ref[kh * 7:kh * 7 + 1, :]
        for kw in range(1, 7):
            tap = kh * 7 + kw
            part = part + pad_ref[kh:kh + SH, kw:kw + W, :] * dww_ref[tap:tap + 1, :]
        acc_ref[...] += part
    dw = acc_ref[...].reshape(Ms, sumd)

    # ---- recursive gated pointwise chain (tiny levels on the VPU, rest on MXU) ----
    pwa = fused_ref[0, pl.ds(r0, SH), :, sumd:sumd + d0]          # (SH, W, d0)
    cur = pwa.astype(jnp.float32).reshape(Ms, d0) * dw[:, 0:d0]
    off = d0
    for j in range(n_pw):
        kin = dims_g[j]
        nj = dims_g[j + 1]
        gate = dw[:, off:off + nj]
        if kin <= 16:
            # tiny matmul: broadcast-FMA on the VPU instead of a full MXU pass
            wj = pw_w[j][...]
            y = cur[:, 0:1] * wj[0:1, :] + pw_b[j][...]
            for kk in range(1, kin):
                y = y + cur[:, kk:kk + 1] * wj[kk:kk + 1, :]
        else:
            y = jnp.dot(cur.astype(jnp.bfloat16), pw_w[j][...].astype(jnp.bfloat16),
                        preferred_element_type=jnp.float32) + pw_b[j][...]
        cur = y * gate
        off += nj

    y = jnp.dot(cur.astype(jnp.bfloat16), pow_ref[...].astype(jnp.bfloat16),
                preferred_element_type=jnp.float32) + pob_ref[...]

    # ---- x + gamma1 * gnconv(norm1(x)) ----
    res = x_ref[0].astype(jnp.float32).reshape(Ms, dim)
    o_ref[0] = (res + g_ref[...] * y).reshape(SH, W, dim).astype(o_ref.dtype)


# ----------------------------- kernel wrappers ------------------------------

def pallas_ln_matmul(x, ln_w, ln_b, w, b, activation=None, eps=1e-6, out_dtype=None):
    M, K = x.shape
    N = w.shape[1]
    tm, tn = _row_tile(M), _col_tile(N)
    out_dtype = _ACT_DTYPE if out_dtype is None else out_dtype
    grid = (pl.cdiv(M, tm), pl.cdiv(N, tn))
    return pl.pallas_call(
        functools.partial(_ln_matmul_kernel, eps=eps, activation=activation),
        grid=grid,
        in_specs=[pl.BlockSpec((tm, K), lambda i, j: (i, 0)),
                  pl.BlockSpec((1, K), lambda i, j: (0, 0)),
                  pl.BlockSpec((1, K), lambda i, j: (0, 0)),
                  pl.BlockSpec((K, tn), lambda i, j: (0, j)),
                  pl.BlockSpec((1, tn), lambda i, j: (0, j))],
        out_specs=pl.BlockSpec((tm, tn), lambda i, j: (i, j)),
        out_shape=jax.ShapeDtypeStruct((M, N), out_dtype),
        scratch_shapes=[pltpu.VMEM((tm, K), jnp.bfloat16)],
        # N axis kept "arbitrary" so the cached LN scratch is never split across cores
        compiler_params=_cparams("parallel", "arbitrary"),
    )(x, ln_w, ln_b, w, b)


def pallas_matmul_res(x, w, b, res, gamma):
    # out = res + gamma * (x @ w + b); the residual buffer is aliased to the output.
    M, K = x.shape
    N = w.shape[1]
    tm, tn = _row_tile(M), _col_tile(N)
    grid = (pl.cdiv(M, tm), pl.cdiv(N, tn))
    return pl.pallas_call(
        _matmul_res_kernel,
        grid=grid,
        in_specs=[pl.BlockSpec((tm, K), lambda i, j: (i, 0)),
                  pl.BlockSpec((K, tn), lambda i, j: (0, j)),
                  pl.BlockSpec((1, tn), lambda i, j: (0, j)),
                  pl.BlockSpec((tm, tn), lambda i, j: (i, j)),
                  pl.BlockSpec((1, tn), lambda i, j: (0, j))],
        out_specs=pl.BlockSpec((tm, tn), lambda i, j: (i, j)),
        out_shape=jax.ShapeDtypeStruct((M, N), res.dtype),
        input_output_aliases={3: 0},
        compiler_params=_cparams("parallel", "parallel"),
    )(x, w, b, res, gamma)


def pallas_patchify(x2d, w, b, *, taps, c_in, pre_ln=None, post_ln=None, eps=1e-6):
    M, K = x2d.shape
    N = w.shape[1]
    tm = _row_tile(M)
    tn = N if post_ln is not None else _col_tile(N)   # post-LN epilogue needs full N
    grid = (pl.cdiv(M, tm), pl.cdiv(N, tn))

    in_specs = [pl.BlockSpec((tm, K), lambda i, j: (i, 0))]
    args = [x2d]
    if pre_ln is not None:
        in_specs += [pl.BlockSpec((1, c_in), lambda i, j: (0, 0)),
                     pl.BlockSpec((1, c_in), lambda i, j: (0, 0))]
        args += [pre_ln[0], pre_ln[1]]
    in_specs += [pl.BlockSpec((K, tn), lambda i, j: (0, j)),
                 pl.BlockSpec((1, tn), lambda i, j: (0, j))]
    args += [w, b]
    if post_ln is not None:
        in_specs += [pl.BlockSpec((1, tn), lambda i, j: (0, j)),
                     pl.BlockSpec((1, tn), lambda i, j: (0, j))]
        args += [post_ln[0], post_ln[1]]
    scratch = [pltpu.VMEM((tm, tn), jnp.float32)] if pre_ln is not None else []

    return pl.pallas_call(
        functools.partial(_patchify_kernel, taps=taps, c_in=c_in, eps=eps,
                          pre_ln=pre_ln is not None, post_ln=post_ln is not None),
        grid=grid,
        in_specs=in_specs,
        out_specs=pl.BlockSpec((tm, tn), lambda i, j: (i, j)),
        out_shape=jax.ShapeDtypeStruct((M, N), _ACT_DTYPE),
        scratch_shapes=scratch,
        compiler_params=_cparams("parallel", "parallel"),
    )(*args)


def pallas_gnconv(fused, x_nhwc, gn, gamma1):
    # Everything in gnconv after proj_in, plus the gamma1 residual, strip-tiled over H.
    B, H, W, dim = x_nhwc.shape
    dims_g = gn["dims"]
    n_pw = len(dims_g) - 1
    sumd = sum(dims_g)
    fused4 = fused.reshape(B, H, W, 2 * dim)
    SH = _strip_rows(H)
    n_strips = H // SH

    def rep(shape):
        nd = len(shape)
        return pl.BlockSpec(shape, lambda b, s, _nd=nd: (0,) * _nd)

    in_specs = [pl.BlockSpec((1, H, W, 2 * dim), lambda b, s: (b, 0, 0, 0)),  # whole image, revisited
                pl.BlockSpec((1, SH, W, dim), lambda b, s: (b, s, 0, 0)),
                rep((49, sumd)), rep((1, sumd))]
    in_specs += [rep((dims_g[j], dims_g[j + 1])) for j in range(n_pw)]
    in_specs += [rep((1, dims_g[j + 1])) for j in range(n_pw)]
    in_specs += [rep((dim, dim)), rep((1, dim)), rep((1, dim))]

    args = ([fused4, x_nhwc, gn["dw_w"], gn["dw_b"]]
            + list(gn["pws_w"]) + list(gn["pws_b"])
            + [gn["proj_out_w"], gn["proj_out_b"], gamma1])

    return pl.pallas_call(
        functools.partial(_gnconv_kernel, dims_g=tuple(dims_g), H=H, SH=SH),
        grid=(B, n_strips),
        in_specs=in_specs,
        out_specs=pl.BlockSpec((1, SH, W, dim), lambda b, s: (b, s, 0, 0)),
        out_shape=jax.ShapeDtypeStruct((B, H, W, dim), x_nhwc.dtype),
        scratch_shapes=[pltpu.VMEM((SH + 6, W + 6, sumd), jnp.float32),   # halo window
                        pltpu.VMEM((SH, W, sumd), jnp.float32)],          # dw accumulator
        input_output_aliases={1: 0},
        compiler_params=_cparams("parallel", "parallel"),   # B x strips -> both TCs even at B=1
    )(*args)


# ----------------------------- model (glue) ------------------------------

def patchify_conv(x, w, b, k, pre_ln=None, post_ln=None):
    # non-overlapping kxk stride-k conv (no padding) == space-to-depth + matmul;
    # patches are flattened (kh, kw, cin) so each original pixel's channels stay
    # contiguous and the channels_first LayerNorm can fuse into the matmul prologue.
    B, H, W, C = x.shape
    Ho, Wo = H // k, W // k
    p = (x.reshape(B, Ho, k, Wo, k, C)
          .transpose(0, 1, 3, 2, 4, 5)               # (B, Ho, Wo, kh, kw, C)
          .reshape(B * Ho * Wo, k * k * C))
    y = pallas_patchify(p, w, b, taps=k * k, c_in=C, pre_ln=pre_ln, post_ln=post_ln)
    return y.reshape(B, Ho, Wo, w.shape[1])


def block_forward(x, p):
    B, H, W, C = x.shape
    M = B * H * W
    flat = x.reshape(M, C)
    # K1: LN1 (channels_first == row LN in NHWC) fused into proj_in matmul
    fused = pallas_ln_matmul(flat, p["norm1_w"], p["norm1_b"],
                             p["gnconv"]["proj_in_w"], p["gnconv"]["proj_in_b"])
    # K2: dwconv7 + gated pointwise chain + proj_out + gamma1 residual (strip-tiled)
    x1_4 = pallas_gnconv(fused, x, p["gnconv"], p["gamma1"])
    x1 = x1_4.reshape(M, C)
    # K3: LN2 (channels_last) + pwconv1 + GELU
    h = pallas_ln_matmul(x1, p["norm2_w"], p["norm2_b"],
                         p["pw1_w"], p["pw1_b"], activation="gelu")
    # K4: pwconv2 + gamma2 residual (in place of x1)
    out = pallas_matmul_res(h, p["pw2_w"], p["pw2_b"], x1, p["gamma2"])
    return out.reshape(B, H, W, C)


def hornet_forward(params, x_nchw):
    x = jnp.transpose(x_nchw, (0, 2, 3, 1)).astype(_ACT_DTYPE)        # NCHW -> NHWC
    for i in range(4):
        ds = params["downsample"][i]
        if i == 0:
            # stem 4x4 /4 conv with the post-conv LayerNorm fused as an epilogue
            x = patchify_conv(x, ds["conv_w"], ds["conv_b"], 4,
                              post_ln=(ds["ln_w"], ds["ln_b"]))
        else:
            # downsample: preceding channels_first LN fused into the conv-matmul prologue
            x = patchify_conv(x, ds["conv_w"], ds["conv_b"], 2,
                              pre_ln=(ds["ln_w"], ds["ln_b"]))
        for blk in params["stages"][i]:
            x = block_forward(x, blk)
    pooled = jnp.mean(x.astype(jnp.float32), axis=(1, 2))             # == x.mean([-2,-1]) in NCHW
    # final LayerNorm fused into the classification head matmul
    return pallas_ln_matmul(pooled, params["norm_w"], params["norm_b"],
                            params["head_w"], params["head_b"], out_dtype=jnp.float32)


# ----------------------------- parameter init ------------------------------

class KeyGen:
    def __init__(self, seed):
        self.key = jax.random.PRNGKey(seed)

    def __call__(self):
        self.key, sub = jax.random.split(self.key)
        return sub


def trunc_normal(kg, shape, std=0.02):
    return jax.random.truncated_normal(kg(), -2.0, 2.0, shape, jnp.float32) * std


def init_hornet_params(kg, in_chans, num_classes, depths, dims, order=5,
                       ls_init=1e-6, gn_scale=1.0):  # reference gnconv default: s = 1.0
    def conv_mat(cout, cin, k, dtype=_W_DTYPE):
        # torch Conv2d weight (cout, cin, kh, kw) -> (kh*kw*cin, cout); patches are
        # flattened in the same (kh, kw, cin) order by patchify_conv.
        w = trunc_normal(kg, (cout, cin, k, k))
        return jnp.transpose(w, (2, 3, 1, 0)).reshape(k * k * cin, cout).astype(dtype)

    def linear_mat(cin, cout, dtype=_W_DTYPE):
        return trunc_normal(kg, (cout, cin)).T.astype(dtype)

    def zeros_b(n):
        return jnp.zeros((1, n), jnp.float32)

    def ln(n):
        return jnp.ones((1, n), jnp.float32), jnp.zeros((1, n), jnp.float32)

    params = {"downsample": [], "stages": []}
    lnw, lnb = ln(dims[0])
    params["downsample"].append({"conv_w": conv_mat(dims[0], in_chans, 4),
                                 "conv_b": zeros_b(dims[0]), "ln_w": lnw, "ln_b": lnb})
    for i in range(3):
        lnw, lnb = ln(dims[i])
        params["downsample"].append({"ln_w": lnw, "ln_b": lnb,
                                     "conv_w": conv_mat(dims[i + 1], dims[i], 2),
                                     "conv_b": zeros_b(dims[i + 1])})
    for i in range(4):
        dim = dims[i]
        blocks = []
        for _ in range(depths[i]):
            dims_g = [dim // 2 ** j for j in range(order)][::-1]
            sumd = sum(dims_g)
            d0 = dims_g[0]
            # proj_in columns reordered so the big `abc` slice (torch channels
            # d0..2*dim-1) starts at lane 0 and `pwa` sits at the end.
            pi_w = conv_mat(2 * dim, dim, 1, dtype=jnp.float32)
            pi_b = zeros_b(2 * dim)
            perm = np.concatenate([np.arange(d0, 2 * dim), np.arange(d0)])
            pi_w = pi_w[:, perm].astype(_W_DTYPE)
            pi_b = pi_b[:, perm]
            gn = {
                "dims": dims_g,
                "proj_in_w": pi_w, "proj_in_b": pi_b,
                # gnconv scale `s` is folded into the depthwise weights/bias; tap
                # index = kh*7+kw on the sublane axis, channels on the lane axis.
                "dw_w": trunc_normal(kg, (7, 7, sumd)).reshape(49, sumd) * gn_scale,
                "dw_b": zeros_b(sumd) * gn_scale,
                "pws_w": [linear_mat(dims_g[j], dims_g[j + 1], dtype=jnp.float32)
                          for j in range(order - 1)],
                "pws_b": [zeros_b(dims_g[j + 1]) for j in range(order - 1)],
                "proj_out_w": conv_mat(dim, dim, 1), "proj_out_b": zeros_b(dim),
            }
            n1w, n1b = ln(dim)
            n2w, n2b = ln(dim)
            blocks.append({
                "norm1_w": n1w, "norm1_b": n1b, "gnconv": gn,
                "norm2_w": n2w, "norm2_b": n2b,
                "pw1_w": linear_mat(dim, 4 * dim), "pw1_b": zeros_b(4 * dim),
                "pw2_w": linear_mat(4 * dim, dim), "pw2_b": zeros_b(dim),
                "gamma1": jnp.full((1, dim), ls_init, jnp.float32),
                "gamma2": jnp.full((1, dim), ls_init, jnp.float32),
            })
        params["stages"].append(blocks)
    nw, nb = ln(dims[-1])
    params["norm_w"], params["norm_b"] = nw, nb
    params["head_w"] = linear_mat(dims[-1], num_classes)   # head_init_scale = 1.0
    params["head_b"] = zeros_b(num_classes)
    return params


# ----------------------------- main ------------------------------

if __name__ == "__main__":
    # small config: base_dim=32, depths=[1,1,1,1], gnconv order 5, drop_path=0 (identity)
    base_dim = 32
    depths = [1, 1, 1, 1]
    dims = [base_dim, base_dim * 2, base_dim * 4, base_dim * 8]
    in_chans, num_classes = 3, 8

    kg = KeyGen(0)
    params = init_hornet_params(kg, in_chans, num_classes, depths, dims)

    x = jax.random.normal(jax.random.PRNGKey(0), (2, in_chans, 32, 32), jnp.float32)  # NCHW

    logits = hornet_forward(params, x)
    logits = jax.block_until_ready(logits)
    assert logits.shape == (2, num_classes)
    assert bool(jnp.all(jnp.isfinite(logits)))
    print("KERNEL_OK")
</pallas_src>

<mosaic_0001>
module attributes {stable_mosaic.version = 11 : i64} {
  func.func @_patchify_kernel(%arg0: i32, %arg1: i32, %arg2: memref<128x48xbf16, #tpu.memory_space<vmem>>, %arg3: memref<48x32xbf16, #tpu.memory_space<vmem>>, %arg4: memref<1x32xf32, #tpu.memory_space<vmem>>, %arg5: memref<1x32xf32, #tpu.memory_space<vmem>>, %arg6: memref<1x32xf32, #tpu.memory_space<vmem>>, %arg7: memref<128x32xbf16, #tpu.memory_space<vmem>>) attributes {dimension_semantics = [#tpu.dimension_semantics<parallel>, #tpu.dimension_semantics<parallel>], iteration_bounds = array<i64: 1, 1>, scalar_prefetch = 0 : i64, scratch_operands = 0 : i64, tpu.core_type = #tpu.core_type<tc>, window_params = [{transform_indices = @transform_0, window_bounds = array<i64: 128, 48>}, {transform_indices = @transform_1, window_bounds = array<i64: 48, 32>}, {transform_indices = @transform_2, window_bounds = array<i64: 1, 32>}, {transform_indices = @transform_3, window_bounds = array<i64: 1, 32>}, {transform_indices = @transform_4, window_bounds = array<i64: 1, 32>}, {transform_indices = @transform_5, window_bounds = array<i64: 128, 32>}]} {
    %c0 = arith.constant 0 : index
    %c0_0 = arith.constant 0 : index
    %0 = vector.load %arg2[%c0, %c0_0] : memref<128x48xbf16, #tpu.memory_space<vmem>>, vector<128x48xbf16>
    %c0_1 = arith.constant 0 : index
    %c0_2 = arith.constant 0 : index
    %1 = vector.load %arg3[%c0_1, %c0_2] : memref<48x32xbf16, #tpu.memory_space<vmem>>, vector<48x32xbf16>
    %cst = arith.constant dense<0.000000e+00> : vector<128x32xf32>
    %2 = tpu.matmul %0, %1, %cst {dimension_numbers = #tpu.dot_dimension_numbers<[1], [0], [0], [1], [0, 0, 1, 1], [], []>} : vector<128x48xbf16>, vector<48x32xbf16>, vector<128x32xf32> -> vector<128x32xf32>
    %c0_3 = arith.constant 0 : index
    %c0_4 = arith.constant 0 : index
    %3 = vector.load %arg4[%c0_3, %c0_4] : memref<1x32xf32, #tpu.memory_space<vmem>>, vector<1x32xf32>
    %4 = vector.broadcast %3 : vector<1x32xf32> to vector<128x32xf32>
    %5 = arith.addf %2, %4 : vector<128x32xf32>
    %c0_5 = arith.constant 0 : index
    %c0_6 = arith.constant 0 : index
    %6 = vector.load %arg5[%c0_5, %c0_6] : memref<1x32xf32, #tpu.memory_space<vmem>>, vector<1x32xf32>
    %c0_7 = arith.constant 0 : index
    %c0_8 = arith.constant 0 : index
    %7 = vector.load %arg6[%c0_7, %c0_8] : memref<1x32xf32, #tpu.memory_space<vmem>>, vector<1x32xf32>
    %cst_9 = arith.constant dense<0.000000e+00> : vector<128xf32>
    %8 = vector.multi_reduction <add>, %5, %cst_9 [1] : vector<128x32xf32> to vector<128xf32>
    %9 = vector.shape_cast %8 : vector<128xf32> to vector<128x1xf32>
    %cst_10 = arith.constant 3.200000e+01 : f32
    %10 = vector.broadcast %cst_10 : f32 to vector<128x1xf32>
    %11 = arith.divf %9, %10 : vector<128x1xf32>
    %12 = vector.broadcast %11 : vector<128x1xf32> to vector<128x32xf32>
    %13 = arith.subf %5, %12 : vector<128x32xf32>
    %14 = arith.mulf %13, %13 : vector<128x32xf32>
    %cst_11 = arith.constant dense<0.000000e+00> : vector<128xf32>
    %15 = vector.multi_reduction <add>, %14, %cst_11 [1] : vector<128x32xf32> to vector<128xf32>
    %16 = vector.shape_cast %15 : vector<128xf32> to vector<128x1xf32>
    %cst_12 = arith.constant 3.200000e+01 : f32
    %17 = vector.broadcast %cst_12 : f32 to vector<128x1xf32>
    %18 = arith.divf %16, %17 : vector<128x1xf32>
    %cst_13 = arith.constant 9.99999997E-7 : f32
    %19 = vector.broadcast %cst_13 : f32 to vector<128x1xf32>
    %20 = arith.addf %18, %19 : vector<128x1xf32>
    %21 = math.rsqrt %20 : vector<128x1xf32>
    %22 = vector.broadcast %21 : vector<128x1xf32> to vector<128x32xf32>
    %23 = arith.mulf %13, %22 : vector<128x32xf32>
    %24 = vector.broadcast %6 : vector<1x32xf32> to vector<128x32xf32>
    %25 = arith.mulf %23, %24 : vector<128x32xf32>
    %26 = vector.broadcast %7 : vector<1x32xf32> to vector<128x32xf32>
    %27 = arith.addf %25, %26 : vector<128x32xf32>
    %28 = arith.truncf %27 : vector<128x32xf32> to vector<128x32xbf16>
    %c0_14 = arith.constant 0 : index
    %c0_15 = arith.constant 0 : index
    %29 = vector.load %arg7[%c0_14, %c0_15] : memref<128x32xbf16, #tpu.memory_space<vmem>>, vector<128x32xbf16>
    tpu.vector_store %arg7[%c0_14, %c0_15], %28 {strides = array<i32>} : memref<128x32xbf16, #tpu.memory_space<vmem>>, vector<128x32xbf16>,
    return
  }
  func.func @transform_0(%arg0: i32, %arg1: i32) -> (i32, i32) {
    %c0_i32 = arith.constant 0 : i32
    %c0_i32_0 = arith.constant 0 : i32
    return %arg0, %c0_i32 : i32, i32
  }
  func.func @transform_1(%arg0: i32, %arg1: i32) -> (i32, i32) {
    %c0_i32 = arith.constant 0 : i32
    %c0_i32_0 = arith.constant 0 : i32
    return %c0_i32, %arg1 : i32, i32
  }
  func.func @transform_2(%arg0: i32, %arg1: i32) -> (i32, i32) {
    %c0_i32 = arith.constant 0 : i32
    %c0_i32_0 = arith.constant 0 : i32
    return %c0_i32, %arg1 : i32, i32
  }
  func.func @transform_3(%arg0: i32, %arg1: i32) -> (i32, i32) {
    %c0_i32 = arith.constant 0 : i32
    %c0_i32_0 = arith.constant 0 : i32
    return %c0_i32, %arg1 : i32, i32
  }
  func.func @transform_4(%arg0: i32, %arg1: i32) -> (i32, i32) {
    %c0_i32 = arith.constant 0 : i32
    %c0_i32_0 = arith.constant 0 : i32
    return %c0_i32, %arg1 : i32, i32
  }
  func.func @transform_5(%arg0: i32, %arg1: i32) -> (i32, i32) {
    %c0_i32 = arith.constant 0 : i32
    return %arg0, %arg1 : i32, i32
  }
}

</mosaic_0001>

<bundles_post_ra>
// kernel: tpu_custom_call.1
= control target key start
LH: loop header
LB: loop body
LE: loop exit
PB: predicated region body
PF: predicated region fallthrough
CT: control target
= control target key end

     0   :  { %vm108_vm0 = vcmask 392192   ;;  %vm232_vm1 = vcmask 261120   ;;  %vm550_vm2 = vcmask 257024   ;;  %s1063_s1 = inlined_call_operand.vmem [shape: bf16[48,32], index: 1, kind: input, shape index: {}]   ;;  %s1064_s0 = inlined_call_operand.vmem [shape: bf16[128,48], index: 0, kind: input, shape index: {}]   ;;  %s1065_s2 = inlined_call_operand.vmem [shape: f32[1,32], index: 2, kind: input, shape index: {}]   ;;  %s1066_s3 = inlined_call_operand.vmem [shape: f32[1,32], index: 3, kind: input, shape index: {}]   ;;  %s1067_s4 = inlined_call_operand.vmem [shape: f32[1,32], index: 4, kind: input, shape index: {}]   ;;  %s1068_s5 = inlined_call_operand.vmem [shape: bf16[128,32], index: 5, kind: output, shape index: {}]  }
   0x1   :  { %v664_v0 = vld [vmem:[%s1063_s1] sm:$0xff]   ;;  %v665_v1 = vld [vmem:[%s1063_s1 + $0x8] sm:$0xff]   ;;  %v666_v2 = vld [vmem:[%s1063_s1 + $0x10] sm:$0xff]  }
   0x2   :  { %636 = vmatprep.subr.bf16.mxu0 %v664_v0  ;;  %658 = vmatprep.subr.bf16.mxu1 %v664_v0  ;;  %v667_v3 = vld [vmem:[%s1064_s0] sm:$0xff]   ;;  %v669_v5 = vld [vmem:[%s1064_s0 + $0x8] sm:$0xff]   ;;  %v671_v7 = vld [vmem:[%s1064_s0 + $0x10] sm:$0xff]  }
   0x3   :  { %637 = vmatpush3.bf16.msra.mxu0 %v664_v0  ;;  %661 = vmatpush3.bf16.msra.mxu1 %v664_v0  ;;  %v668_v4 = vld [vmem:[%s1064_s0 + $0x20] sm:$0xff]   ;;  %v670_v6 = vld [vmem:[%s1064_s0 + $0x28] sm:$0xff]   ;;  %v673_v8 = vld [vmem:[%s1064_s0 + $0x30] sm:$0xff]  }
   0x4   :  { %638 = vmatprep.subr.bf16.mxu0 %v665_v1  ;;  %659 = vmatprep.subr.bf16.mxu1 %v665_v1  ;;  %v672_v9 = vld [vmem:[%s1064_s0 + $0x18] sm:$0xff]   ;;  %v571_v11 = vld [vmem:[%s1065_s2] ss:$0 sm:$0xff] }
   0x5   :  { %642 = vmatprep.mubr.msk.bf16.mxu0 %vm108_vm0, %v667_v3  ;;  %650 = vmatprep.mubr.msk.bf16.mxu1 %vm108_vm0, %v668_v4  ;;  %v674_v10 = vld [vmem:[%s1064_s0 + $0x38] sm:$0xff]  }
   0x7   :  { %639 = vmatpush3.bf16.msra.mxu0 %v665_v1  ;;  %662 = vmatpush3.bf16.msra.mxu1 %v665_v1 }
   0x8   :  { %640 = vmatprep.subr.bf16.mxu0 %v666_v2  ;;  %660 = vmatprep.subr.bf16.mxu1 %v666_v2 }
   0xb   :  { %641 = vmatpush3.bf16.msra.mxu0 %v666_v2  ;;  %663 = vmatpush3.bf16.msra.mxu1 %v666_v2 }
   0xe   :  { %643 = vmatmul.mubr.msk.bf16.vlgmr.msra.gmra.mrb[0].mxu0 %vm108_vm0, %v669_v5  ;;  %651 = vmatmul.mubr.msk.bf16.vlgmr.msra.gmra.mrb[0].mxu1 %vm108_vm0, %v670_v6 }
   0xf   :  { %646 = vmatprep.mubr.msk.bf16.mxu0 %vm108_vm0, %v671_v7  ;;  %654 = vmatprep.mubr.msk.bf16.mxu1 %vm108_vm0, %v673_v8 }
  0x16   :  { %647 = vmatmul.mubr.msk.bf16.gmra.mrb[4].mxu0 %vm108_vm0, %v672_v9  ;;  %655 = vmatmul.mubr.msk.bf16.gmra.mrb[4].mxu1 %vm108_vm0, %v674_v10 }
  0xe1   :  { %v644_v12 = vpop.f32.mrb[0].mxu0  ;;  %v652_v13 = vpop.f32.mrb[0].mxu1 }
  0xe2   :  { %v781_v14 = vadd.f32 %v644_v12, %v571_v11  ;;  %v783_v15 = vadd.f32 %v652_v13, %v571_v11  ;;  %v167_v16 = vpop.f32.mrb[1].mxu0  ;;  %v199_v17 = vpop.f32.mrb[1].mxu1 }
  0xe3   :  { %v645_v18 = vpop.f32.mrb[2].mxu0  ;;  %v653_v19 = vpop.f32.mrb[2].mxu1  ;;  %v785_v20 = vadd.f32 %v571_v11, %v167_v16  ;;  %v793_v26 = vadd.f32 %v571_v11, %v199_v17 }
  0xe4   :  { %v787_v21 = vadd.f32 %v645_v18, %v571_v11  ;;  %v170_v22 = vpop.f32.mrb[3].mxu0  ;;  %v202_v23 = vpop.f32.mrb[3].mxu1  ;;  %v263_v24 = vsel %vm232_vm1, %v783_v15, 0.0  ;;  %v239_v25 = vsel %vm232_vm1, %v781_v14, 0.0  ;;  %v795_v27 = vadd.f32 %v653_v19, %v571_v11 }
  0xe5   :  { %264 = vadd.xlane.f32.xlu0 %v263_v24  ;;  %240 = vadd.xlane.f32.xlu1 %v239_v25  ;;  %v233_v29 = vsel %vm232_vm1, %v785_v20, 0.0  ;;  %v801_v36 = vadd.f32 %v571_v11, %v170_v22  ;;  %v803_v37 = vadd.f32 %v571_v11, %v202_v23  ;;  %v257_v39 = vsel %vm232_vm1, %v793_v26, 0.0 }
  0xe6   :  { %v242_v28 = vsel %vm232_vm1, %v787_v21, 0.0  ;;  %v266_v38 = vsel %vm232_vm1, %v795_v27, 0.0 }
  0xe7   :  { %v260_v44 = vsel %vm232_vm1, %v803_v37, 0.0  ;;  %v236_v45 = vsel %vm232_vm1, %v801_v36, 0.0 }
  0xe9   :  { %243 = vadd.xlane.f32.xlu1 %v242_v28  ;;  %234 = vadd.xlane.f32.xlu0 %v233_v29  ;;  %v648_v30 = vpop.f32.mrb[4].mxu0  ;;  %v656_v31 = vpop.f32.mrb[4].mxu1 }
  0xea   :  { %v183_v32 = vpop.f32.mrb[5].mxu0  ;;  %v215_v33 = vpop.f32.mrb[5].mxu1  ;;  %v809_v42 = vadd.f32 %v648_v30, %v571_v11  ;;  %v837_v56 = vadd.f32 %v656_v31, %v571_v11 }
  0xeb   :  { %v649_v34 = vpop.f32.mrb[6].mxu0  ;;  %v657_v35 = vpop.f32.mrb[6].mxu1  ;;  %v821_v48 = vadd.f32 %v571_v11, %v183_v32  ;;  %v825_v50 = vadd.f32 %v571_v11, %v215_v33 }
  0xec   :  { %v186_v40 = vpop.f32.mrb[7].mxu0  ;;  %v218_v41 = vpop.f32.mrb[7].mxu1  ;;  %v811_v43 = vadd.f32 %v649_v34, %v571_v11  ;;  %v251_v47 = vsel %vm232_vm1, %v809_v42, 0.0  ;;  %v839_v57 = vadd.f32 %v657_v35, %v571_v11  ;;  %v275_v59 = vsel %vm232_vm1, %v837_v56, 0.0 }
  0xed   :  { %267 = vadd.xlane.f32.xlu1 %v266_v38  ;;  %258 = vadd.xlane.f32.xlu0 %v257_v39  ;;  %v823_v49 = vadd.f32 %v571_v11, %v186_v40  ;;  %v827_v51 = vadd.f32 %v571_v11, %v218_v41  ;;  %v245_v53 = vsel %vm232_vm1, %v821_v48, 0.0  ;;  %v269_v55 = vsel %vm232_vm1, %v825_v50, 0.0 }
  0xee   :  { %v254_v46 = vsel %vm232_vm1, %v811_v43, 0.0  ;;  %v278_v58 = vsel %vm232_vm1, %v839_v57, 0.0 }
  0xef   :  { %v248_v52 = vsel %vm232_vm1, %v823_v49, 0.0  ;;  %v272_v54 = vsel %vm232_vm1, %v827_v51, 0.0 }
  0xf1   :  { %261 = vadd.xlane.f32.xlu1 %v260_v44  ;;  %237 = vadd.xlane.f32.xlu0 %v236_v45 }
  0xf5   :  { %255 = vadd.xlane.f32.xlu1 %v254_v46  ;;  %252 = vadd.xlane.f32.xlu0 %v251_v47 }
  0xf9   :  { %249 = vadd.xlane.f32.xlu1 %v248_v52  ;;  %246 = vadd.xlane.f32.xlu0 %v245_v53 }
  0xfd   :  { %273 = vadd.xlane.f32.xlu1 %v272_v54  ;;  %270 = vadd.xlane.f32.xlu0 %v269_v55 }
 0x101   :  { %279 = vadd.xlane.f32.xlu1 %v278_v58  ;;  %276 = vadd.xlane.f32.xlu0 %v275_v59 }
 0x172   :  { %v265_v60 = vpop.xlane.xlu0 %264  ;;  %v241_v61 = vpop.xlane.xlu1 %240 }
 0x173   :  { %v292_v62 = vmul.f32 0.03125, %v265_v60  ;;  %v284_v63 = vmul.f32 0.03125, %v241_v61 }
 0x175   :  { %v846_v0 = vsub.f32 %v783_v15, %v292_v62  ;;  %v849_v1 = vsub.f32 %v781_v14, %v284_v63 }
 0x176   :  { %v244_v2 = vpop.xlane.xlu1 %243  ;;  %v235_v3 = vpop.xlane.xlu0 %234 }
 0x177   :  { %v285_v4 = vmul.f32 0.03125, %v244_v2  ;;  %v282_v5 = vmul.f32 0.03125, %v235_v3  ;;  %v316_v6 = vmul.f32 %v849_v1, %v849_v1  ;;  %v324_v10 = vmul.f32 %v846_v0, %v846_v0 }
 0x179   :  { %v854_v7 = vsub.f32 %v787_v21, %v285_v4  ;;  %v857_v8 = vsub.f32 %v785_v20, %v282_v5  ;;  %v336_v9 = vsel %vm232_vm1, %v316_v6, 0.0  ;;  %v360_v20 = vsel %vm232_vm1, %v324_v10, 0.0 }
 0x17a   :  { %v268_v11 = vpop.xlane.xlu1 %267  ;;  %337 = vadd.xlane.f32.xlu0 %v336_v9  ;;  %v259_v12 = vpop.xlane.xlu0 %258 }
 0x17b   :  { %v293_v13 = vmul.f32 0.03125, %v268_v11  ;;  %v290_v14 = vmul.f32 0.03125, %v259_v12  ;;  %v317_v15 = vmul.f32 %v854_v7, %v854_v7  ;;  %v314_v16 = vmul.f32 %v857_v8, %v857_v8 }
 0x17d   :  { %v867_v17 = vsub.f32 %v795_v27, %v293_v13  ;;  %v870_v18 = vsub.f32 %v793_v26, %v290_v14  ;;  %v339_v19 = vsel %vm232_vm1, %v317_v15, 0.0  ;;  %v330_v28 = vsel %vm232_vm1, %v314_v16, 0.0 }
 0x17e   :  { %v262_v21 = vpop.xlane.xlu1 %261  ;;  %340 = vadd.xlane.f32.xlu1 %v339_v19  ;;  %361 = vadd.xlane.f32.xlu0 %v360_v20  ;;  %v238_v22 = vpop.xlane.xlu0 %237 }
 0x17f   :  { %v291_v23 = vmul.f32 0.03125, %v262_v21  ;;  %v283_v24 = vmul.f32 0.03125, %v238_v22  ;;  %v325_v25 = vmul.f32 %v867_v17, %v867_v17  ;;  %v322_v30 = vmul.f32 %v870_v18, %v870_v18 }
 0x181   :  { %v878_v27 = vsub.f32 %v803_v37, %v291_v23  ;;  %v881_v26 = vsub.f32 %v801_v36, %v283_v24  ;;  %v363_v29 = vsel %vm232_vm1, %v325_v25, 0.0  ;;  %v354_v39 = vsel %vm232_vm1, %v322_v30, 0.0 }
 0x182   :  { %v256_v31 = vpop.xlane.xlu1 %255  ;;  %364 = vadd.xlane.f32.xlu1 %v363_v29  ;;  %331 = vadd.xlane.f32.xlu0 %v330_v28  ;;  %v253_v32 = vpop.xlane.xlu0 %252 }
 0x183   :  { %v289_v33 = vmul.f32 0.03125, %v256_v31  ;;  %v288_v34 = vmul.f32 0.03125, %v253_v32  ;;  %v315_v35 = vmul.f32 %v881_v26, %v881_v26  ;;  %v323_v37 = vmul.f32 %v878_v27, %v878_v27 }
 0x185   :  { %v891_v36 = vsub.f32 %v811_v43, %v289_v33  ;;  %v894_v38 = vsub.f32 %v809_v42, %v288_v34  ;;  %v333_v40 = vsel %vm232_vm1, %v315_v35, 0.0  ;;  %v357_v52 = vsel %vm232_vm1, %v323_v37, 0.0 }
 0x186   :  { %v250_v41 = vpop.xlane.xlu1 %249  ;;  %355 = vadd.xlane.f32.xlu0 %v354_v39  ;;  %334 = vadd.xlane.f32.xlu1 %v333_v40  ;;  %v247_v44 = vpop.xlane.xlu0 %246 }
 0x187   :  { %v287_v45 = vmul.f32 0.03125, %v250_v41  ;;  %v286_v46 = vmul.f32 0.03125, %v247_v44  ;;  %v320_v47 = vmul.f32 %v894_v38, %v894_v38  ;;  %v321_v54 = vmul.f32 %v891_v36, %v891_v36  ;;  %v944_v44 = vld [vmem:[%s1066_s3] ss:$0 sm:$0xff] }
 0x189   :  { %v902_v43 = vsub.f32 %v823_v49, %v287_v45  ;;  %v905_v42 = vsub.f32 %v821_v48, %v286_v46  ;;  %v348_v53 = vsel %vm232_vm1, %v320_v47, 0.0  ;;  %v351_v63 = vsel %vm232_vm1, %v321_v54, 0.0  ;;  %v950_v54 = vld [vmem:[%s1067_s4] ss:$0 sm:$0xff] }
 0x18a   :  { %v274_v55 = vpop.xlane.xlu1 %273  ;;  %358 = vadd.xlane.f32.xlu1 %v357_v52  ;;  %349 = vadd.xlane.f32.xlu0 %v348_v53  ;;  %v271_v58 = vpop.xlane.xlu0 %270 }
 0x18b   :  { %v295_v59 = vmul.f32 0.03125, %v274_v55  ;;  %v294_v60 = vmul.f32 0.03125, %v271_v58  ;;  %v318_v61 = vmul.f32 %v905_v42, %v905_v42  ;;  %v319_v49 = vmul.f32 %v902_v43, %v902_v43 }
 0x18d   :  { %v915_v48 = vsub.f32 %v827_v51, %v295_v59  ;;  %v918_v62 = vsub.f32 %v825_v50, %v294_v60  ;;  %v342_v2 = vsel %vm232_vm1, %v318_v61, 0.0  ;;  %v345_v10 = vsel %vm232_vm1, %v319_v49, 0.0 }
 0x18e   :  { %v280_v3 = vpop.xlane.xlu1 %279  ;;  %352 = vadd.xlane.f32.xlu1 %v351_v63  ;;  %343 = vadd.xlane.f32.xlu0 %v342_v2  ;;  %v277_v4 = vpop.xlane.xlu0 %276 }
 0x18f   :  { %v297_v5 = vmul.f32 0.03125, %v280_v3  ;;  %v296_v6 = vmul.f32 0.03125, %v277_v4  ;;  %v326_v9 = vmul.f32 %v918_v62, %v918_v62  ;;  %v327_v12 = vmul.f32 %v915_v48, %v915_v48 }
 0x191   :  { %v926_v51 = vsub.f32 %v839_v57, %v297_v5  ;;  %v929_v50 = vsub.f32 %v837_v56, %v296_v6  ;;  %v366_v11 = vsel %vm232_vm1, %v326_v9, 0.0  ;;  %v369_v14 = vsel %vm232_vm1, %v327_v12, 0.0 }
 0x192   :  { %346 = vadd.xlane.f32.xlu1 %v345_v10  ;;  %367 = vadd.xlane.f32.xlu0 %v366_v11 }
 0x193   :  { %v328_v13 = vmul.f32 %v929_v50, %v929_v50  ;;  %v329_v57 = vmul.f32 %v926_v51, %v926_v51 }
 0x195   :  { %v372_v15 = vsel %vm232_vm1, %v328_v13, 0.0  ;;  %v375_v56 = vsel %vm232_vm1, %v329_v57, 0.0 }
 0x196   :  { %370 = vadd.xlane.f32.xlu1 %v369_v14  ;;  %373 = vadd.xlane.f32.xlu0 %v372_v15 }
 0x19a   :  { %376 = vadd.xlane.f32.xlu1 %v375_v56 }
 0x207   :  { %v338_v16 = vpop.xlane.xlu0 %337 }
 0x208   :  { %v380_v19 = vmul.f32 0.03125, %v338_v16 }
 0x20a   :  { %v396_v20 = vadd.f32 1e-06, %v380_v19 }
 0x20b   :  { %v341_v21 = vpop.xlane.xlu1 %340  ;;  %v362_v22 = vpop.xlane.xlu0 %361 }
 0x20c   :  { %675 = vrsqrt.f32 %v396_v20  ;;  %v381_v23 = vmul.f32 0.03125, %v341_v21  ;;  %v388_v24 = vmul.f32 0.03125, %v362_v22 }
 0x20e   :  { %v397_v25 = vadd.f32 1e-06, %v381_v23  ;;  %v404_v28 = vadd.f32 1e-06, %v388_v24 }
 0x20f   :  { %v365_v29 = vpop.xlane.xlu1 %364  ;;  %v332_v30 = vpop.xlane.xlu0 %331 }
 0x210   :  { %677 = vrsqrt.f32 %v397_v25  ;;  %v389_v31 = vmul.f32 0.03125, %v365_v29  ;;  %v378_v32 = vmul.f32 0.03125, %v332_v30 }
 0x211   :  { %679 = vrsqrt.f32 %v404_v28 }
 0x212   :  { %v405_v33 = vadd.f32 1e-06, %v389_v31  ;;  %v394_v34 = vadd.f32 1e-06, %v378_v32 }
 0x213   :  { %v335_v35 = vpop.xlane.xlu1 %334  ;;  %v356_v37 = vpop.xlane.xlu0 %355 }
 0x214   :  { %681 = vrsqrt.f32 %v405_v33  ;;  %v379_v39 = vmul.f32 0.03125, %v335_v35  ;;  %v386_v40 = vmul.f32 0.03125, %v356_v37 }
 0x215   :  { %683 = vrsqrt.f32 %v394_v34 }
 0x216   :  { %v676_v41 = vpop.eup %675  ;;  %v395_v45 = vadd.f32 1e-06, %v379_v39  ;;  %v402_v46 = vadd.f32 1e-06, %v386_v40 }
 0x217   :  { %v428_v47 = vmul.f32 %v676_v41, %v849_v1  ;;  %v359_v52 = vpop.xlane.xlu1 %358  ;;  %v350_v53 = vpop.xlane.xlu0 %349 }
 0x218   :  { %685 = vrsqrt.f32 %v395_v45  ;;  %v387_v55 = vmul.f32 0.03125, %v359_v52  ;;  %v384_v58 = vmul.f32 0.03125, %v350_v53 }
 0x219   :  { %v450_v59 = vmul.f32 %v944_v44, %v428_v47  ;;  %687 = vrsqrt.f32 %v402_v46 }
 0x21a   :  { %v678_v60 = vpop.eup %677  ;;  %v403_v61 = vadd.f32 1e-06, %v387_v55  ;;  %v400_v49 = vadd.f32 1e-06, %v384_v58 }
 0x21b   :  { %v680_v63 = vpop.eup %679  ;;  %v472_v1 = vadd.f32 %v950_v54, %v450_v59  ;;  %v429_v2 = vmul.f32 %v678_v60, %v854_v7  ;;  %v353_v3 = vpop.xlane.xlu1 %352 }
 0x21c   :  { %v344_v4 = vpop.xlane.xlu0 %343  ;;  %v436_v5 = vmul.f32 %v680_v63, %v846_v0  ;;  %689 = vrsqrt.f32 %v403_v61  ;;  %v385_v6 = vmul.f32 0.03125, %v353_v3 }
 0x21d   :  { %v382_v9 = vmul.f32 0.03125, %v344_v4  ;;  %v611_v10 = vpack.c.bf16 %v472_v1, %v472_v1  ;;  %v451_v11 = vmul.f32 %v944_v44, %v429_v2  ;;  %691 = vrsqrt.f32 %v400_v49 }
 0x21e   :  { %v682_v12 = vpop.eup %681  ;;  %v458_v13 = vmul.f32 %v944_v44, %v436_v5  ;;  %v401_v14 = vadd.f32 1e-06, %v385_v6 }
 0x21f   :  { %v398_v15 = vadd.f32 1e-06, %v382_v9  ;;  %v684_v57 = vpop.eup %683  ;;  %553 = vst.msk [vmem:[%s1068_s5 + $0x8] sm:$0xf] %vm550_vm2, %v611_v10  ;;  %v473_v0 = vadd.f32 %v950_v54, %v451_v11  ;;  %v437_v7 = vmul.f32 %v682_v12, %v867_v17  ;;  %v347_v56 = vpop.xlane.xlu1 %346 }
 0x220   :  { %v368_v16 = vpop.xlane.xlu0 %367  ;;  %v480_v19 = vadd.f32 %v950_v54, %v458_v13  ;;  %v426_v20 = vmul.f32 %v684_v57, %v857_v8  ;;  %693 = vrsqrt.f32 %v401_v14  ;;  %v383_v21 = vmul.f32 0.03125, %v347_v56 }
 0x221   :  { %v612_v22 = vpack.c.bf16 %v473_v0, %v473_v0  ;;  %v459_v23 = vmul.f32 %v944_v44, %v437_v7  ;;  %695 = vrsqrt.f32 %v398_v15  ;;  %v390_v24 = vmul.f32 0.03125, %v368_v16 }
 0x222   :  { %v686_v25 = vpop.eup %685  ;;  %v619_v28 = vpack.c.bf16 %v480_v19, %v480_v19  ;;  %v448_v29 = vmul.f32 %v944_v44, %v426_v20  ;;  %v399_v30 = vadd.f32 1e-06, %v383_v21 }
 0x223   :  { %v688_v31 = vpop.eup %687  ;;  %554 = vst.msk [vmem:[%s1068_s5 + $0xc] sm:$0xf] %vm550_vm2, %v612_v22  ;;  %v481_v8 = vadd.f32 %v950_v54, %v459_v23  ;;  %v427_v17 = vmul.f32 %v686_v25, %v881_v26  ;;  %v406_v32 = vadd.f32 1e-06, %v390_v24  ;;  %v371_v33 = vpop.xlane.xlu1 %370 }
 0x224   :  { %v374_v34 = vpop.xlane.xlu0 %373  ;;  %561 = vst.msk [vmem:[%s1068_s5 + $0x28] sm:$0xf] %vm550_vm2, %v619_v28  ;;  %v470_v35 = vadd.f32 %v950_v54, %v448_v29  ;;  %v434_v37 = vmul.f32 %v688_v31, %v870_v18  ;;  %697 = vrsqrt.f32 %v399_v30  ;;  %v391_v39 = vmul.f32 0.03125, %v371_v33 }
 0x225   :  { %v620_v40 = vpack.c.bf16 %v481_v8, %v481_v8  ;;  %v449_v41 = vmul.f32 %v944_v44, %v427_v17  ;;  %699 = vrsqrt.f32 %v406_v32  ;;  %v392_v45 = vmul.f32 0.03125, %v374_v34 }
 0x226   :  { %v690_v26 = vpop.eup %689  ;;  %v609_v46 = vpack.c.bf16 %v470_v35, %v470_v35  ;;  %v456_v47 = vmul.f32 %v944_v44, %v434_v37  ;;  %v407_v52 = vadd.f32 1e-06, %v391_v39 }
 0x227   :  { %v692_v53 = vpop.eup %691  ;;  %562 = vst.msk [vmem:[%s1068_s5 + $0x2c] sm:$0xf] %vm550_vm2, %v620_v40  ;;  %v471_v18 = vadd.f32 %v950_v54, %v449_v41  ;;  %v435_v55 = vmul.f32 %v690_v26, %v878_v27  ;;  %v408_v58 = vadd.f32 1e-06, %v392_v45  ;;  %v377_v59 = vpop.xlane.xlu1 %376 }
 0x228   :  { %551 = vst.msk [vmem:[%s1068_s5] sm:$0xf] %vm550_vm2, %v609_v46  ;;  %v478_v60 = vadd.f32 %v950_v54, %v456_v47  ;;  %v432_v61 = vmul.f32 %v692_v53, %v894_v38  ;;  %701 = vrsqrt.f32 %v407_v52  ;;  %v393_v49 = vmul.f32 0.03125, %v377_v59 }
 0x229   :  { %v610_v63 = vpack.c.bf16 %v471_v18, %v471_v18  ;;  %v457_v1 = vmul.f32 %v944_v44, %v435_v55  ;;  %703 = vrsqrt.f32 %v408_v58 }
 0x22a   :  { %v694_v2 = vpop.eup %693  ;;  %v617_v3 = vpack.c.bf16 %v478_v60, %v478_v60  ;;  %v454_v27 = vmul.f32 %v944_v44, %v432_v61  ;;  %v409_v4 = vadd.f32 1e-06, %v393_v49 }
 0x22b   :  { %v696_v5 = vpop.eup %695  ;;  %552 = vst.msk [vmem:[%s1068_s5 + $0x4] sm:$0xf] %vm550_vm2, %v610_v63  ;;  %v479_v6 = vadd.f32 %v950_v54, %v457_v1  ;;  %v433_v38 = vmul.f32 %v694_v2, %v891_v36 }
 0x22c   :  { %559 = vst.msk [vmem:[%s1068_s5 + $0x20] sm:$0xf] %vm550_vm2, %v617_v3  ;;  %v476_v9 = vadd.f32 %v950_v54, %v454_v27  ;;  %v430_v10 = vmul.f32 %v696_v5, %v905_v42  ;;  %705 = vrsqrt.f32 %v409_v4 }
 0x22d   :  { %v618_v11 = vpack.c.bf16 %v479_v6, %v479_v6  ;;  %v455_v12 = vmul.f32 %v944_v44, %v433_v38 }
 0x22e   :  { %v698_v13 = vpop.eup %697  ;;  %v615_v14 = vpack.c.bf16 %v476_v9, %v476_v9  ;;  %v452_v15 = vmul.f32 %v944_v44, %v430_v10 }
 0x22f   :  { %v700_v57 = vpop.eup %699  ;;  %560 = vst.msk [vmem:[%s1068_s5 + $0x24] sm:$0xf] %vm550_vm2, %v618_v11  ;;  %v477_v36 = vadd.f32 %v950_v54, %v455_v12  ;;  %v431_v0 = vmul.f32 %v698_v13, %v902_v43 }
 0x230   :  { %557 = vst.msk [vmem:[%s1068_s5 + $0x18] sm:$0xf] %vm550_vm2, %v615_v14  ;;  %v474_v42 = vadd.f32 %v950_v54, %v452_v15  ;;  %v438_v7 = vmul.f32 %v700_v57, %v918_v62 }
 0x231   :  { %v616_v56 = vpack.c.bf16 %v477_v36, %v477_v36  ;;  %v453_v16 = vmul.f32 %v944_v44, %v431_v0 }
 0x232   :  { %v702_v19 = vpop.eup %701  ;;  %v613_v20 = vpack.c.bf16 %v474_v42, %v474_v42  ;;  %v460_v21 = vmul.f32 %v944_v44, %v438_v7 }
 0x233   :  { %v704_v22 = vpop.eup %703  ;;  %558 = vst.msk [vmem:[%s1068_s5 + $0x1c] sm:$0xf] %vm550_vm2, %v616_v56  ;;  %v475_v43 = vadd.f32 %v950_v54, %v453_v16  ;;  %v439_v23 = vmul.f32 %v702_v19, %v915_v48 }
 0x234   :  { %555 = vst.msk [vmem:[%s1068_s5 + $0x10] sm:$0xf] %vm550_vm2, %v613_v20  ;;  %v482_v62 = vadd.f32 %v950_v54, %v460_v21  ;;  %v440_v24 = vmul.f32 %v704_v22, %v929_v50 }
 0x235   :  { %v614_v25 = vpack.c.bf16 %v475_v43, %v475_v43  ;;  %v461_v28 = vmul.f32 %v944_v44, %v439_v23 }
 0x236   :  { %v706_v29 = vpop.eup %705  ;;  %v621_v30 = vpack.c.bf16 %v482_v62, %v482_v62  ;;  %v462_v31 = vmul.f32 %v944_v44, %v440_v24 }
 0x237   :  { %556 = vst.msk [vmem:[%s1068_s5 + $0x14] sm:$0xf] %vm550_vm2, %v614_v25  ;;  %v483_v48 = vadd.f32 %v950_v54, %v461_v28  ;;  %v441_v8 = vmul.f32 %v706_v29, %v926_v51 }
 0x238   :  { %563 = vst.msk [vmem:[%s1068_s5 + $0x30] sm:$0xf] %vm550_vm2, %v621_v30  ;;  %v484_v50 = vadd.f32 %v950_v54, %v462_v31 }
 0x239   :  { %v622_v17 = vpack.c.bf16 %v483_v48, %v483_v48  ;;  %v463_v32 = vmul.f32 %v944_v44, %v441_v8 }
 0x23a   :  { %v623_v33 = vpack.c.bf16 %v484_v50, %v484_v50 }
 0x23b   :  { %564 = vst.msk [vmem:[%s1068_s5 + $0x34] sm:$0xf] %vm550_vm2, %v622_v17  ;;  %v485_v34 = vadd.f32 %v950_v54, %v463_v32 }
 0x23c   :  { %565 = vst.msk [vmem:[%s1068_s5 + $0x38] sm:$0xf] %vm550_vm2, %v623_v33 }
 0x23d   :  { %v624_v51 = vpack.c.bf16 %v485_v34, %v485_v34 }
 0x23f   :  { %566 = vst.msk [vmem:[%s1068_s5 + $0x3c] sm:$0xf] %vm550_vm2, %v624_v51 }

</bundles_post_ra>
